<compile_context>
chip_gen: v7x
topology: tpu7x:2x2x1
jax: 0.10.0
libtpu: 0.0.40
codegen_flags: <defaults>
</compile_context>

<pallas_src>
import functools

import jax
import jax.numpy as jnp
from jax import lax
from jax.experimental import pallas as pl
from jax.experimental.pallas import tpu as pltpu

_LANES = 128


def _device_kind():
    try:
        return jax.devices()[0].device_kind.lower()
    except Exception:
        return ""


def _default_ncores(kind):
    # Chips with 2 TensorCores visible to one program: v4 / v5p / v7x.
    return 2 if any(tag in kind for tag in ("v7", "7x", "v4", "v5p")) else 1


def _default_tile_rows(kind):
    # Per-input f32 block bytes: ~1 MiB everywhere, ~4 MiB on v7x (3.2 TB/s HBM
    # needs bigger steps to keep the ~0.35us/step overhead small).
    return 8192 if ("v7" in kind or "7x" in kind) else 2048


def _disc_loss_kernel(
    real_ref, fake_ref, out_ref, acc_r_ref, acc_f_ref, *,
    tiles_per_core,
    rows_real, tiles_real, block_rows_real,
    rows_fake, tiles_fake, block_rows_fake,
    w_real, w_fake,
):
    c = pl.program_id(0)          # core (outer, "parallel") axis
    t = pl.program_id(1)          # tile (inner, "arbitrary") axis
    g = c * tiles_per_core + t    # global tile index

    @pl.when(t == 0)
    def _():
        acc_r_ref[...] = jnp.zeros_like(acc_r_ref)
        acc_f_ref[...] = jnp.zeros_like(acc_f_ref)

    def _fold(acc_ref, sq):
        # Fold the tile into a small accumulator with vreg-wise VALU adds only.
        if acc_ref.shape == sq.shape:
            acc_ref[...] += sq
        else:
            acc_ref[...] += jnp.sum(sq.reshape(-1, 8, _LANES), axis=0)

    def _accumulate(ref, acc_ref, bias, rows, tiles, block_rows):
        def _contrib(x):
            d = x - bias
            _fold(acc_ref, d * d)

        # Interior tiles: fully valid, zero masking work.
        @pl.when(g < tiles - 1)
        def _():
            _contrib(ref[...].astype(jnp.float32))

        # Last (possibly ragged) tile: mask rows past the end of this input.
        # Masking selects the neutral value *before* squaring so stale OOB
        # buffer contents (incl. NaN/Inf) can never leak into the sum.
        @pl.when(g == tiles - 1)
        def _():
            x = ref[...].astype(jnp.float32)
            row = lax.broadcasted_iota(jnp.int32, (block_rows, _LANES), 0)
            valid = (g * block_rows + row) < rows
            _contrib(jnp.where(valid, x, bias))

    _accumulate(real_ref, acc_r_ref, 1.0, rows_real, tiles_real, block_rows_real)
    _accumulate(fake_ref, acc_f_ref, 0.0, rows_fake, tiles_fake, block_rows_fake)

    @pl.when(t == tiles_per_core - 1)
    def _():
        # One cross-lane reduction per core + deferred (epilogue-only) weighting.
        out_ref[0, 0] = (
            jnp.sum(acc_r_ref[...]) * w_real + jnp.sum(acc_f_ref[...]) * w_fake
        )


def _to_rows128(x, neutral):
    """Lane-dense (rows, 128) view of x in its native dtype (no f32 copy)."""
    flat = x.reshape(-1)
    n = flat.shape[0]
    rem = n % _LANES
    if rem:
        # Only non-128-aligned element counts pay this (<128-elem neutral pad);
        # 128-aligned inputs are pure reshapes with zero extra HBM traffic.
        flat = jnp.pad(flat, (0, _LANES - rem), constant_values=neutral)
    rows = flat.shape[0] // _LANES
    return flat.reshape(rows, _LANES), rows


def _reference(real_outputs, fake_outputs):
    r = real_outputs.astype(jnp.float32)
    f = fake_outputs.astype(jnp.float32)
    return jnp.mean((r - 1.0) ** 2 / 2.0) + jnp.mean(f ** 2 / 2.0)


def discriminate_loss(real_outputs, fake_outputs, *, tile_rows=None, ncores=None,
                      min_kernel_elems=1 << 17):
    n_r = int(real_outputs.size)
    n_f = int(fake_outputs.size)

    # Tiny (or empty) discriminator outputs: fixed pallas_call / DMA-pipeline
    # overhead dominates; plain XLA fusion is faster and handles empty inputs.
    if n_r == 0 or n_f == 0 or (n_r + n_f) <= min_kernel_elems:
        return _reference(real_outputs, fake_outputs)

    kind = _device_kind()
    if ncores is None:
        ncores = _default_ncores(kind)
    if tile_rows is None:
        tile_rows = _default_tile_rows(kind)
    tile_rows = max(32, (tile_rows // 32) * 32)   # sublane-safe for any dtype

    r2d, rows_r = _to_rows128(real_outputs, 1.0)
    f2d, rows_f = _to_rows128(fake_outputs, 0.0)

    def _blocking(rows):
        if rows <= tile_rows:
            return rows, 1                       # whole-array block (always legal)
        return tile_rows, pl.cdiv(rows, tile_rows)

    block_rows_r, tiles_r = _blocking(rows_r)
    block_rows_f, tiles_f = _blocking(rows_f)

    max_tiles = max(tiles_r, tiles_f)
    ncores = max(1, min(ncores, max_tiles))
    tiles_per_core = pl.cdiv(max_tiles, ncores)

    def _acc_shape(block_rows):
        return (8, _LANES) if block_rows % 8 == 0 else (block_rows, _LANES)

    def _in_map(tiles_x):
        def imap(c, t):
            g = c * tiles_per_core + t
            # Clamp: block index repeats past this input's range -> DMA elided,
            # so the shorter input never streams padding from HBM.
            return (jnp.minimum(g, tiles_x - 1), 0)
        return imap

    kernel = functools.partial(
        _disc_loss_kernel,
        tiles_per_core=tiles_per_core,
        rows_real=rows_r, tiles_real=tiles_r, block_rows_real=block_rows_r,
        rows_fake=rows_f, tiles_fake=tiles_f, block_rows_fake=block_rows_f,
        w_real=0.5 / n_r, w_fake=0.5 / n_f,
    )

    block_bytes = _LANES * (
        block_rows_r * r2d.dtype.itemsize + block_rows_f * f2d.dtype.itemsize
    )
    # double-buffered inputs + elementwise temporaries, capped with v7x headroom
    vmem_limit = int(min(56 << 20, max(32 << 20, 4 * block_bytes + (8 << 20))))

    partials = pl.pallas_call(
        kernel,
        out_shape=jax.ShapeDtypeStruct((ncores, 1), jnp.float32),
        grid_spec=pltpu.PrefetchScalarGridSpec(
            num_scalar_prefetch=0,
            grid=(ncores, tiles_per_core),
            in_specs=[
                pl.BlockSpec((block_rows_r, _LANES), _in_map(tiles_r)),
                pl.BlockSpec((block_rows_f, _LANES), _in_map(tiles_f)),
            ],
            out_specs=pl.BlockSpec(
                (1, 1), lambda c, t: (c, 0), memory_space=pltpu.SMEM
            ),
            scratch_shapes=[
                pltpu.VMEM(_acc_shape(block_rows_r), jnp.float32),
                pltpu.VMEM(_acc_shape(block_rows_f), jnp.float32),
            ],
        ),
        compiler_params=pltpu.CompilerParams(
            # TODO(synk): on v7x, pltpu.CORE_PARALLEL on the outer axis may be
            # needed to guarantee both TensorCores stream; verify with a trace.
            dimension_semantics=("parallel", "arbitrary"),
            vmem_limit_bytes=vmem_limit,
        ),
        cost_estimate=pl.CostEstimate(
            flops=4 * (n_r + n_f),
            transcendentals=0,
            bytes_accessed=(
                r2d.size * r2d.dtype.itemsize
                + f2d.size * f2d.dtype.itemsize
                + ncores * 4
            ),
        ),
    )(r2d, f2d)

    # Tiny wrapper-side reduction over per-core partials.
    return jnp.sum(partials)


if __name__ == "__main__":
    key = jax.random.PRNGKey(0)
    k_real, k_fake = jax.random.split(key)

    # 1) Small, 128-aligned discriminator outputs (patch-GAN-style logits);
    #    force the Pallas path despite the small-input fallback threshold.
    real_a = jax.random.normal(k_real, (2, 4, 16, 16), dtype=jnp.float32)
    fake_a = jax.random.normal(k_fake, (2, 4, 16, 16), dtype=jnp.float32)
    loss_a = discriminate_loss(real_a, fake_a, min_kernel_elems=0)
    jax.block_until_ready(loss_a)
    ref_a = _reference(real_a, fake_a)
    assert jnp.allclose(loss_a, ref_a, rtol=1e-5, atol=1e-5), (loss_a, ref_a)

    # Default threshold routes the same tiny inputs through the jnp fallback.
    loss_fb = discriminate_loss(real_a, fake_a)
    jax.block_until_ready(loss_fb)
    assert jnp.allclose(loss_fb, ref_a, rtol=1e-5, atol=1e-5), (loss_fb, ref_a)

    # 2) Ragged, non-128-aligned, unequal shapes (neutral tail pad path).
    real_b = jax.random.normal(k_real, (3, 5, 7, 11), dtype=jnp.float32)
    fake_b = jax.random.normal(k_fake, (2, 3, 9, 13), dtype=jnp.float32)
    loss_b = discriminate_loss(real_b, fake_b, min_kernel_elems=0)
    jax.block_until_ready(loss_b)
    ref_b = _reference(real_b, fake_b)
    assert jnp.allclose(loss_b, ref_b, rtol=1e-5, atol=1e-5), (loss_b, ref_b)

    # 3) Multi-tile, asymmetric sizes with explicit small tiles + 2-core grid
    #    (exercises in-kernel tail masking, clamped index maps, per-core partials).
    real_c = jax.random.normal(k_real, (1, 3, 700, 128), dtype=jnp.float32)
    fake_c = jax.random.normal(k_fake, (2, 5, 100, 128), dtype=jnp.float32)
    loss_c = discriminate_loss(real_c, fake_c, tile_rows=512, ncores=2,
                               min_kernel_elems=0)
    jax.block_until_ready(loss_c)
    ref_c = _reference(real_c, fake_c)
    assert jnp.allclose(loss_c, ref_c, rtol=1e-4, atol=1e-5), (loss_c, ref_c)

    print("KERNEL_OK")
</pallas_src>

<mosaic_0001>
module attributes {stable_mosaic.version = 11 : i64} {
  func.func @_disc_loss_kernel(%arg0: i32, %arg1: i32, %arg2: memref<16x128xf32, #tpu.memory_space<vmem>>, %arg3: memref<16x128xf32, #tpu.memory_space<vmem>>, %arg4: memref<1x1xf32, #tpu.memory_space<smem>>, %arg5: memref<8x128xf32, #tpu.memory_space<vmem>>, %arg6: memref<8x128xf32, #tpu.memory_space<vmem>>) attributes {dimension_semantics = [#tpu.dimension_semantics<parallel>, #tpu.dimension_semantics<arbitrary>], iteration_bounds = array<i64: 1, 1>, scalar_prefetch = 0 : i64, scratch_operands = 2 : i64, tpu.core_type = #tpu.core_type<tc>, window_params = [{transform_indices = @transform_0, window_bounds = array<i64: 16, 128>}, {transform_indices = @transform_1, window_bounds = array<i64: 16, 128>}, {transform_indices = @transform_2, window_bounds = array<i64: 1, 1>}]} {
    %c1_i32 = arith.constant 1 : i32
    %0 = arith.muli %arg0, %c1_i32 : i32
    %1 = arith.addi %0, %arg1 : i32
    %c0_i32 = arith.constant 0 : i32
    %2 = arith.cmpi eq, %arg1, %c0_i32 : i32
    %3 = arith.extui %2 : i1 to i32
    %c0_i32_0 = arith.constant 0 : i32
    %4 = arith.cmpi ne, %3, %c0_i32_0 : i32
    scf.if %4 {
      %cst = arith.constant 0.000000e+00 : f32
      %20 = vector.broadcast %cst : f32 to vector<8x128xf32>
      %c0 = arith.constant 0 : index
      %c0_11 = arith.constant 0 : index
      %21 = vector.load %arg5[%c0, %c0_11] : memref<8x128xf32, #tpu.memory_space<vmem>>, vector<8x128xf32>
      tpu.vector_store %arg5[%c0, %c0_11], %20 {strides = array<i32>} : memref<8x128xf32, #tpu.memory_space<vmem>>, vector<8x128xf32>,
      %cst_12 = arith.constant 0.000000e+00 : f32
      %22 = vector.broadcast %cst_12 : f32 to vector<8x128xf32>
      %c0_13 = arith.constant 0 : index
      %c0_14 = arith.constant 0 : index
      %23 = vector.load %arg6[%c0_13, %c0_14] : memref<8x128xf32, #tpu.memory_space<vmem>>, vector<8x128xf32>
      tpu.vector_store %arg6[%c0_13, %c0_14], %22 {strides = array<i32>} : memref<8x128xf32, #tpu.memory_space<vmem>>, vector<8x128xf32>,
    } else {
    }
    %c0_i32_1 = arith.constant 0 : i32
    %5 = arith.cmpi slt, %1, %c0_i32_1 : i32
    %6 = arith.extui %5 : i1 to i32
    %c0_i32_2 = arith.constant 0 : i32
    %7 = arith.cmpi ne, %6, %c0_i32_2 : i32
    scf.if %7 {
      %c0 = arith.constant 0 : index
      %c0_11 = arith.constant 0 : index
      %20 = vector.load %arg2[%c0, %c0_11] : memref<16x128xf32, #tpu.memory_space<vmem>>, vector<16x128xf32>
      %cst = arith.constant 1.000000e+00 : f32
      %21 = vector.broadcast %cst : f32 to vector<16x128xf32>
      %22 = arith.subf %20, %21 : vector<16x128xf32>
      %23 = arith.mulf %22, %22 : vector<16x128xf32>
      %c0_12 = arith.constant 0 : index
      %c0_13 = arith.constant 0 : index
      %24 = vector.load %arg5[%c0_12, %c0_13] : memref<8x128xf32, #tpu.memory_space<vmem>>, vector<8x128xf32>
      %25 = vector.shape_cast %23 : vector<16x128xf32> to vector<2x8x128xf32>
      %cst_14 = arith.constant dense<0.000000e+00> : vector<8x128xf32>
      %26 = vector.multi_reduction <add>, %25, %cst_14 [0] : vector<2x8x128xf32> to vector<8x128xf32>
      %27 = arith.addf %24, %26 : vector<8x128xf32>
      %c0_15 = arith.constant 0 : index
      %c0_16 = arith.constant 0 : index
      %28 = vector.load %arg5[%c0_15, %c0_16] : memref<8x128xf32, #tpu.memory_space<vmem>>, vector<8x128xf32>
      tpu.vector_store %arg5[%c0_15, %c0_16], %27 {strides = array<i32>} : memref<8x128xf32, #tpu.memory_space<vmem>>, vector<8x128xf32>,
    } else {
    }
    %c0_i32_3 = arith.constant 0 : i32
    %8 = arith.cmpi eq, %1, %c0_i32_3 : i32
    %9 = arith.extui %8 : i1 to i32
    %c0_i32_4 = arith.constant 0 : i32
    %10 = arith.cmpi ne, %9, %c0_i32_4 : i32
    scf.if %10 {
      %c0 = arith.constant 0 : index
      %c0_11 = arith.constant 0 : index
      %20 = vector.load %arg2[%c0, %c0_11] : memref<16x128xf32, #tpu.memory_space<vmem>>, vector<16x128xf32>
      %21 = tpu.iota {dimensions = array<i32: 0>} : vector<16x128xi32>
      %c16_i32 = arith.constant 16 : i32
      %22 = arith.muli %1, %c16_i32 : i32
      %23 = vector.broadcast %22 : i32 to vector<16x128xi32>
      %24 = arith.addi %23, %21 : vector<16x128xi32>
      %c16_i32_12 = arith.constant 16 : i32
      %25 = vector.broadcast %c16_i32_12 : i32 to vector<16x128xi32>
      %26 = arith.cmpi slt, %24, %25 : vector<16x128xi32>
      %cst = arith.constant 1.000000e+00 : f32
      %27 = vector.broadcast %cst : f32 to vector<16x128xf32>
      %28 = arith.select %26, %20, %27 : vector<16x128xi1>, vector<16x128xf32>
      %cst_13 = arith.constant 1.000000e+00 : f32
      %29 = vector.broadcast %cst_13 : f32 to vector<16x128xf32>
      %30 = arith.subf %28, %29 : vector<16x128xf32>
      %31 = arith.mulf %30, %30 : vector<16x128xf32>
      %c0_14 = arith.constant 0 : index
      %c0_15 = arith.constant 0 : index
      %32 = vector.load %arg5[%c0_14, %c0_15] : memref<8x128xf32, #tpu.memory_space<vmem>>, vector<8x128xf32>
      %33 = vector.shape_cast %31 : vector<16x128xf32> to vector<2x8x128xf32>
      %cst_16 = arith.constant dense<0.000000e+00> : vector<8x128xf32>
      %34 = vector.multi_reduction <add>, %33, %cst_16 [0] : vector<2x8x128xf32> to vector<8x128xf32>
      %35 = arith.addf %32, %34 : vector<8x128xf32>
      %c0_17 = arith.constant 0 : index
      %c0_18 = arith.constant 0 : index
      %36 = vector.load %arg5[%c0_17, %c0_18] : memref<8x128xf32, #tpu.memory_space<vmem>>, vector<8x128xf32>
      tpu.vector_store %arg5[%c0_17, %c0_18], %35 {strides = array<i32>} : memref<8x128xf32, #tpu.memory_space<vmem>>, vector<8x128xf32>,
    } else {
    }
    %c0_i32_5 = arith.constant 0 : i32
    %11 = arith.cmpi slt, %1, %c0_i32_5 : i32
    %12 = arith.extui %11 : i1 to i32
    %c0_i32_6 = arith.constant 0 : i32
    %13 = arith.cmpi ne, %12, %c0_i32_6 : i32
    scf.if %13 {
      %c0 = arith.constant 0 : index
      %c0_11 = arith.constant 0 : index
      %20 = vector.load %arg3[%c0, %c0_11] : memref<16x128xf32, #tpu.memory_space<vmem>>, vector<16x128xf32>
      %cst = arith.constant 0.000000e+00 : f32
      %21 = vector.broadcast %cst : f32 to vector<16x128xf32>
      %22 = arith.subf %20, %21 : vector<16x128xf32>
      %23 = arith.mulf %22, %22 : vector<16x128xf32>
      %c0_12 = arith.constant 0 : index
      %c0_13 = arith.constant 0 : index
      %24 = vector.load %arg6[%c0_12, %c0_13] : memref<8x128xf32, #tpu.memory_space<vmem>>, vector<8x128xf32>
      %25 = vector.shape_cast %23 : vector<16x128xf32> to vector<2x8x128xf32>
      %cst_14 = arith.constant dense<0.000000e+00> : vector<8x128xf32>
      %26 = vector.multi_reduction <add>, %25, %cst_14 [0] : vector<2x8x128xf32> to vector<8x128xf32>
      %27 = arith.addf %24, %26 : vector<8x128xf32>
      %c0_15 = arith.constant 0 : index
      %c0_16 = arith.constant 0 : index
      %28 = vector.load %arg6[%c0_15, %c0_16] : memref<8x128xf32, #tpu.memory_space<vmem>>, vector<8x128xf32>
      tpu.vector_store %arg6[%c0_15, %c0_16], %27 {strides = array<i32>} : memref<8x128xf32, #tpu.memory_space<vmem>>, vector<8x128xf32>,
    } else {
    }
    %c0_i32_7 = arith.constant 0 : i32
    %14 = arith.cmpi eq, %1, %c0_i32_7 : i32
    %15 = arith.extui %14 : i1 to i32
    %c0_i32_8 = arith.constant 0 : i32
    %16 = arith.cmpi ne, %15, %c0_i32_8 : i32
    scf.if %16 {
      %c0 = arith.constant 0 : index
      %c0_11 = arith.constant 0 : index
      %20 = vector.load %arg3[%c0, %c0_11] : memref<16x128xf32, #tpu.memory_space<vmem>>, vector<16x128xf32>
      %21 = tpu.iota {dimensions = array<i32: 0>} : vector<16x128xi32>
      %c16_i32 = arith.constant 16 : i32
      %22 = arith.muli %1, %c16_i32 : i32
      %23 = vector.broadcast %22 : i32 to vector<16x128xi32>
      %24 = arith.addi %23, %21 : vector<16x128xi32>
      %c16_i32_12 = arith.constant 16 : i32
      %25 = vector.broadcast %c16_i32_12 : i32 to vector<16x128xi32>
      %26 = arith.cmpi slt, %24, %25 : vector<16x128xi32>
      %cst = arith.constant 0.000000e+00 : f32
      %27 = vector.broadcast %cst : f32 to vector<16x128xf32>
      %28 = arith.select %26, %20, %27 : vector<16x128xi1>, vector<16x128xf32>
      %cst_13 = arith.constant 0.000000e+00 : f32
      %29 = vector.broadcast %cst_13 : f32 to vector<16x128xf32>
      %30 = arith.subf %28, %29 : vector<16x128xf32>
      %31 = arith.mulf %30, %30 : vector<16x128xf32>
      %c0_14 = arith.constant 0 : index
      %c0_15 = arith.constant 0 : index
      %32 = vector.load %arg6[%c0_14, %c0_15] : memref<8x128xf32, #tpu.memory_space<vmem>>, vector<8x128xf32>
      %33 = vector.shape_cast %31 : vector<16x128xf32> to vector<2x8x128xf32>
      %cst_16 = arith.constant dense<0.000000e+00> : vector<8x128xf32>
      %34 = vector.multi_reduction <add>, %33, %cst_16 [0] : vector<2x8x128xf32> to vector<8x128xf32>
      %35 = arith.addf %32, %34 : vector<8x128xf32>
      %c0_17 = arith.constant 0 : index
      %c0_18 = arith.constant 0 : index
      %36 = vector.load %arg6[%c0_17, %c0_18] : memref<8x128xf32, #tpu.memory_space<vmem>>, vector<8x128xf32>
      tpu.vector_store %arg6[%c0_17, %c0_18], %35 {strides = array<i32>} : memref<8x128xf32, #tpu.memory_space<vmem>>, vector<8x128xf32>,
    } else {
    }
    %c0_i32_9 = arith.constant 0 : i32
    %17 = arith.cmpi eq, %arg1, %c0_i32_9 : i32
    %18 = arith.extui %17 : i1 to i32
    %c0_i32_10 = arith.constant 0 : i32
    %19 = arith.cmpi ne, %18, %c0_i32_10 : i32
    scf.if %19 {
      %c0 = arith.constant 0 : index
      %c0_11 = arith.constant 0 : index
      %20 = vector.load %arg5[%c0, %c0_11] : memref<8x128xf32, #tpu.memory_space<vmem>>, vector<8x128xf32>
      %21 = vector.shape_cast %20 : vector<8x128xf32> to vector<1x8x128xf32>
      %cst = arith.constant dense<0.000000e+00> : vector<1xf32>
      %22 = vector.multi_reduction <add>, %21, %cst [1, 2] : vector<1x8x128xf32> to vector<1xf32>
      %23 = vector.shape_cast %22 : vector<1xf32> to vector<1x1x1xf32>
      %24 = vector.extract %23[0, 0, 0] : f32 from vector<1x1x1xf32>
      %cst_12 = arith.constant 2.44140625E-4 : f32
      %25 = arith.mulf %24, %cst_12 : f32
      %c0_13 = arith.constant 0 : index
      %c0_14 = arith.constant 0 : index
      %26 = vector.load %arg6[%c0_13, %c0_14] : memref<8x128xf32, #tpu.memory_space<vmem>>, vector<8x128xf32>
      %27 = vector.shape_cast %26 : vector<8x128xf32> to vector<1x8x128xf32>
      %cst_15 = arith.constant dense<0.000000e+00> : vector<1xf32>
      %28 = vector.multi_reduction <add>, %27, %cst_15 [1, 2] : vector<1x8x128xf32> to vector<1xf32>
      %29 = vector.shape_cast %28 : vector<1xf32> to vector<1x1x1xf32>
      %30 = vector.extract %29[0, 0, 0] : f32 from vector<1x1x1xf32>
      %cst_16 = arith.constant 2.44140625E-4 : f32
      %31 = arith.mulf %30, %cst_16 : f32
      %32 = arith.addf %25, %31 : f32
      %c0_17 = arith.constant 0 : index
      %c0_18 = arith.constant 0 : index
      %33 = memref.load %arg4[%c0_17, %c0_18] : memref<1x1xf32, #tpu.memory_space<smem>>
      memref.store %32, %arg4[%c0_17, %c0_18] : memref<1x1xf32, #tpu.memory_space<smem>>
    } else {
    }
    return
  }
  func.func @transform_0(%arg0: i32, %arg1: i32) -> (i32, i32) {
    %c1_i32 = arith.constant 1 : i32
    %0 = arith.muli %arg0, %c1_i32 : i32
    %1 = arith.addi %0, %arg1 : i32
    %c0_i32 = arith.constant 0 : i32
    %2 = arith.minsi %1, %c0_i32 : i32
    %c0_i32_0 = arith.constant 0 : i32
    %c0_i32_1 = arith.constant 0 : i32
    return %2, %c0_i32_0 : i32, i32
  }
  func.func @transform_1(%arg0: i32, %arg1: i32) -> (i32, i32) {
    %c1_i32 = arith.constant 1 : i32
    %0 = arith.muli %arg0, %c1_i32 : i32
    %1 = arith.addi %0, %arg1 : i32
    %c0_i32 = arith.constant 0 : i32
    %2 = arith.minsi %1, %c0_i32 : i32
    %c0_i32_0 = arith.constant 0 : i32
    %c0_i32_1 = arith.constant 0 : i32
    return %2, %c0_i32_0 : i32, i32
  }
  func.func @transform_2(%arg0: i32, %arg1: i32) -> (i32, i32) {
    %c0_i32 = arith.constant 0 : i32
    %c0_i32_0 = arith.constant 0 : i32
    return %arg0, %c0_i32 : i32, i32
  }
}

</mosaic_0001>

<bundles_post_ra>
// kernel: tpu_custom_call.1
= control target key start
LH: loop header
LB: loop body
LE: loop exit
PB: predicated region body
PF: predicated region fallthrough
CT: control target
= control target key end

     0   :  { %7 = vsyncpa [#allocation5], 0  ;;  %s315_s0 = inlined_call_operand.hbm [shape: f32[16,128], index: 0, kind: input, shape index: {}]   ;;  %s316_s1 = inlined_call_operand.hbm [shape: f32[16,128], index: 1, kind: input, shape index: {}]   ;;  %s317_s2 = inlined_call_operand.hbm [shape: f32[1,1], index: 2, kind: output, shape index: {}]  }
   0x1   :  { %8 = vsyncpa [#allocation8], 0 }
   0x2   :  { %9 = vsyncpa [#allocation6], 0  ;;  %s259_s9 = smov [#allocation4]   ;;  %s199_s13 = scalar_lea.hbm %s315_s0, 256 }
   0x3   :  { %s21_s10 = sshll.u32 %s259_s9, 4  ;;  %p200_p0 = scmp.ne.s32.totalorder %s315_s0, %s199_s13  ;;  %s22_s10 = int_to_ptr.vmem [resolvable:$true] %s21_s10 }
   0x4   :  { %p203_p1 = scmp.lt.u32.totalorder %s199_s13, %s315_s0 }
   0x6   :  { %p205_p2 = pnand %p203_p1, %p200_p0 }
   0x8   :  { %208 = shalt.err (!%p205_p2)
}
   0x9   :  { %s209_s18 = scalar_lea.vmem %s22_s10, 256  ;;  %p214_p4 = scmp.lt.s32.totalorder %s22_s10, %s22_s10 }
   0xa   :  { %p210_p3 = scmp.ne.s32.totalorder %s22_s10, %s209_s18  ;;  %p215_p5 = scmp.lt.s32.totalorder %s209_s18, %s209_s18 }
   0xc   :  { %p216_p6 = por %p215_p5, %p214_p4 }
   0xe   :  { %p217_p7 = pnand %p216_p6, %p210_p3 }
  0x10   :  { %220 = shalt.err (!%p217_p7)
}
  0x11   :  { %s260_s19 = smov 128   ;;  %s261_s20 = smov 8  }
  0x12   :  { %27 = dma.hbm_to_vmem [thread:$0]  %s315_s0, 256, %s22_s10, [#allocation5], %s260_s19, %s260_s19, %s261_s20  }
  0x13   :  { %s262_s23 = smov [#allocation7]   ;;  %s221_s27 = scalar_lea.hbm %s316_s1, 256 }
  0x14   :  { %s39_s24 = sshll.u32 %s262_s23, 4  ;;  %p222_p8 = scmp.ne.s32.totalorder %s316_s1, %s221_s27  ;;  %s40_s24 = int_to_ptr.vmem [resolvable:$true] %s39_s24 }
  0x15   :  { %p225_p9 = scmp.lt.u32.totalorder %s221_s27, %s316_s1 }
  0x17   :  { %p227_p10 = pnand %p225_p9, %p222_p8 }
  0x19   :  { %230 = shalt.err (!%p227_p10)
}
  0x1a   :  { %s231_s4 = scalar_lea.vmem %s40_s24, 256  ;;  %p236_p12 = scmp.lt.s32.totalorder %s40_s24, %s40_s24 }
  0x1b   :  { %p232_p11 = scmp.ne.s32.totalorder %s40_s24, %s231_s4  ;;  %p237_p13 = scmp.lt.s32.totalorder %s231_s4, %s231_s4 }
  0x1d   :  { %p238_p0 = por %p237_p13, %p236_p12 }
  0x1f   :  { %p239_p1 = pnand %p238_p0, %p232_p11 }
  0x21   :  { %242 = shalt.err (!%p239_p1)
}
  0x22   :  { %45 = dma.hbm_to_vmem [thread:$0]  %s316_s1, 256, %s40_s24, [#allocation8], %s260_s19, %s260_s19, %s261_s20  }
  0x23   :  { %253 = dma.done.wait [#allocation5], 256  }
  0x24   :  { %254 = vsyncadd [#allocation5], 4294967040 }
  0x25   :  { %255 = dma.done.wait [#allocation8], 256  }
  0x26   :  { %256 = vsyncadd [#allocation8], 4294967040  ;;  %v85_v0 = vld [vmem:[#allocation4] sm:$0xff]  ;;  %v86_v1 = vld [vmem:[#allocation4 + $0x8] sm:$0xff]  ;;  %s243_s12 = scalar_lea.hbm %s317_s2, 16 }
  0x27   :  { %v120_v2 = vld [vmem:[#allocation7] sm:$0xff]  ;;  %v188_v3 = vadd.f32 -1.0, %v85_v0  ;;  %v189_v4 = vadd.f32 -1.0, %v86_v1  ;;  %v121_v5 = vld [vmem:[#allocation7 + $0x8] sm:$0xff]  ;;  %p244_p2 = scmp.ne.s32.totalorder %s317_s2, %s243_s12  ;;  %p247_p3 = scmp.lt.u32.totalorder %s243_s12, %s317_s2 }
  0x28   :  { %v133_v8 = vmul.f32 %v120_v2, %v120_v2  ;;  %v134_v9 = vmul.f32 %v121_v5, %v121_v5 }
  0x29   :  { %v100_v6 = vmul.f32 %v188_v3, %v188_v3  ;;  %v101_v7 = vmul.f32 %v189_v4, %v189_v4  ;;  %p249_p4 = pnand %p247_p3, %p244_p2 }
  0x2a   :  { %v136_v11 = vadd.f32 %v134_v9, %v133_v8 }
  0x2b   :  { %v103_v10 = vadd.f32 %v101_v7, %v100_v6 }
  0x2d   :  { %143 = vadd.xlane.f32.xlu0 %v103_v10 }
  0x31   :  { %154 = vadd.xlane.f32.xlu0 %v136_v11 }
  0xba   :  { %v144_v12 = vpop.xlane.xlu0 %143 }
  0xbb   :  { %v145_v13 = vrot.slane %v144_v12, 4 }
  0xbd   :  { %v146_v14 = vadd.f32 %v145_v13, %v144_v12 }
  0xbe   :  { %v155_v15 = vpop.xlane.xlu0 %154 }
  0xbf   :  { %v147_v16 = vrot.slane %v146_v14, 2  ;;  %v156_v17 = vrot.slane %v155_v15, 4 }
  0xc1   :  { %v157_v18 = vadd.f32 %v156_v17, %v155_v15  ;;  %v148_v19 = vadd.f32 %v147_v16, %v146_v14 }
  0xc3   :  { %v158_v20 = vrot.slane %v157_v18, 2  ;;  %v149_v21 = vrot.slane %v148_v19, 1 }
  0xc5   :  { %v159_v22 = vadd.f32 %v158_v20, %v157_v18  ;;  %v150_v23 = vadd.f32 %v149_v21, %v148_v19 }
  0xc7   :  { %190 = vpush %v150_v23  ;;  %v160_v24 = vrot.slane %v159_v22, 1 }
  0xc9   :  { %v161_v25 = vadd.f32 %v160_v24, %v159_v22 }
  0xcb   :  { %192 = vpush %v161_v25 }
  0xf8   :  { %s191_s1 = spop %190 }
  0xf9   :  { %s152_s6 = smul.f32 0.00024414063, %s191_s1 }
  0xfc   :  { %s193_s7 = spop %192 }
  0xfd   :  { %s163_s8 = smul.f32 0.00024414063, %s193_s7 }
  0xff   :  { %s164_s9 = sadd.f32 %s163_s8, %s152_s6 }
 0x101   :  { %166 = sst [smem:[#allocation9]] %s164_s9 }
 0x102   :  { %252 = shalt.err (!%p249_p4)
}
 0x103   :  { %s263_s17 = smov [#allocation9]  }
 0x104   :  { %174 = dma.smem_to_hbm %s263_s17, 16, %s317_s2, [#allocation6]  }
 0x105   :  { %257 = dma.done.wait [#allocation6], 16  }
 0x106   :  { %258 = vsyncadd [#allocation6], 4294967280 }
 0x107   :  { %178 = sfence }
 0x108   :  { %179 = vsyncpa [#allocation5], 1 }
 0x109   :  { %180 = vsyncpa [#allocation8], 1 }
 0x10a   :  { %181 = vsyncpa [#allocation6], 1 }

</bundles_post_ra>
